<compile_context>
chip_gen: v7x
topology: tpu7x:2x2x1
jax: 0.10.0
libtpu: 0.0.40
codegen_flags: <defaults>
</compile_context>

<pallas_src>
import jax
import jax.numpy as jnp
from jax.experimental import pallas as pl
from jax.experimental.pallas import tpu as pltpu

EMBEDDING_SIZE = 128   # embedding_size = 128 in the module
VOCAB_SIZE = 32        # original vocab=[] is degenerate; use a small synthetic vocab
SEQ_LEN = 8            # small sequence of token ids (exactly 8 sublanes)


def _embeds_kernel(ids_ref, table_ref, out_ref):
    """Embedding lookup as a one-hot matmul on the MXU.

    Writes a dense (seq, emb) block (one f32 vreg at seq=8, emb=128) with a
    single unmasked store; the flatten-to-(1, seq*emb) happens in the wrapper.
    """
    seq = ids_ref.shape[0]
    vocab, _ = table_ref.shape

    ids = ids_ref[...]                                        # (seq, 1) int32
    iota = jax.lax.broadcasted_iota(jnp.int32, (seq, vocab), 1)
    one_hot = (iota == ids).astype(table_ref.dtype)           # (seq, vocab)

    # Single MXU pass; exactly one 1.0 per row with f32 accumulation
    # reproduces each table row bit-exactly. Out-of-range ids -> zero row
    # (documented divergence from torch, which errors on OOB indices).
    gathered = jnp.dot(one_hot, table_ref[...],
                       preferred_element_type=jnp.float32)    # (seq, emb)

    out_ref[...] = gathered.astype(out_ref.dtype)             # one unmasked vst


def embeds_forward(indices, table):
    """Equivalent of embeds.forward: nn.Embedding lookup + .view((1, -1))."""
    seq = indices.shape[0]
    vocab, emb = table.shape
    ids2d = indices.astype(jnp.int32).reshape(seq, 1)         # 2-D for TPU layout

    # TODO(synk): for production vocab sizes, switch to an HBM-resident table
    # (pl.BlockSpec(memory_space=pl.ANY)) with ids in SMEM via
    # PrefetchScalarGridSpec(num_scalar_prefetch=1) driving an Element-indexed
    # row gather (pl.BlockSpec((pl.Element(1), emb), lambda i, ids: (ids[i], 0)))
    # over a 'parallel' seq grid, batching 8-16 rows per step and raising
    # pipeline depth — mandatory ~2x earlier on v7x (64 MiB VMEM). At this toy
    # size the 16 KiB table + 4 KiB output trivially live in VMEM.
    out = pl.pallas_call(
        _embeds_kernel,
        out_shape=jax.ShapeDtypeStruct((seq, emb), table.dtype),
        in_specs=[
            pl.BlockSpec(memory_space=pltpu.MemorySpace.VMEM),  # token ids
            pl.BlockSpec(memory_space=pltpu.MemorySpace.VMEM),  # embedding table
        ],
        out_specs=pl.BlockSpec(memory_space=pltpu.MemorySpace.VMEM),
    )(ids2d, table)

    # torch .view((1, -1)) — row-major flatten of a 4 KiB array in the wrapper
    # (kept out of the kernel so the store stays one dense vreg).
    return out.reshape(1, seq * emb)


if __name__ == "__main__":
    key = jax.random.PRNGKey(0)
    k_table, k_ids = jax.random.split(key)

    # nn.Embedding default weight init: N(0, 1), deterministic via PRNGKey(0)
    table = jax.random.normal(k_table, (VOCAB_SIZE, EMBEDDING_SIZE), dtype=jnp.float32)
    indices = jax.random.randint(k_ids, (SEQ_LEN,), 0, VOCAB_SIZE, dtype=jnp.int32)

    out = embeds_forward(indices, table)
    out = jax.block_until_ready(out)

    assert out.shape == (1, SEQ_LEN * EMBEDDING_SIZE), out.shape

    # correctness check against a plain-JAX reference of the same forward pass
    ref = table[indices].reshape((1, -1))
    assert jnp.allclose(out, ref), "Pallas embedding one-hot matmul mismatch vs reference"

    print("KERNEL_OK")
</pallas_src>

<mosaic_0001>
module attributes {stable_mosaic.version = 11 : i64} {
  func.func @_embeds_kernel(%arg0: memref<8x1xi32, #tpu.memory_space<vmem>>, %arg1: memref<32x128xf32, #tpu.memory_space<vmem>>, %arg2: memref<8x128xf32, #tpu.memory_space<vmem>>) attributes {dimension_semantics = [], scalar_prefetch = 0 : i64, scratch_operands = 0 : i64, tpu.core_type = #tpu.core_type<tc>} {
    %c0 = arith.constant 0 : index
    %c0_0 = arith.constant 0 : index
    %0 = vector.load %arg0[%c0, %c0_0] : memref<8x1xi32, #tpu.memory_space<vmem>>, vector<8x1xi32>
    %1 = tpu.iota {dimensions = array<i32: 1>} : vector<8x32xi32>
    %2 = vector.broadcast %0 : vector<8x1xi32> to vector<8x32xi32>
    %3 = arith.cmpi eq, %1, %2 : vector<8x32xi32>
    %4 = arith.extui %3 : vector<8x32xi1> to vector<8x32xi32>
    %5 = arith.sitofp %4 : vector<8x32xi32> to vector<8x32xf32>
    %c0_1 = arith.constant 0 : index
    %c0_2 = arith.constant 0 : index
    %6 = vector.load %arg1[%c0_1, %c0_2] : memref<32x128xf32, #tpu.memory_space<vmem>>, vector<32x128xf32>
    %cst = arith.constant dense<0.000000e+00> : vector<8x128xf32>
    %7 = tpu.matmul %5, %6, %cst {dimension_numbers = #tpu.dot_dimension_numbers<[1], [0], [0], [1], [0, 0, 1, 1], [], []>} : vector<8x32xf32>, vector<32x128xf32>, vector<8x128xf32> -> vector<8x128xf32>
    %c0_3 = arith.constant 0 : index
    %c0_4 = arith.constant 0 : index
    %8 = vector.load %arg2[%c0_3, %c0_4] : memref<8x128xf32, #tpu.memory_space<vmem>>, vector<8x128xf32>
    tpu.vector_store %arg2[%c0_3, %c0_4], %7 {strides = array<i32>} : memref<8x128xf32, #tpu.memory_space<vmem>>, vector<8x128xf32>,
    return
  }
}

</mosaic_0001>

<bundles_post_ra>
// kernel: tpu_custom_call.1
= control target key start
LH: loop header
LB: loop body
LE: loop exit
PB: predicated region body
PF: predicated region fallthrough
CT: control target
= control target key end

     0   :  { %7 = vsyncpa [#allocation3], 0  ;;  %s260_s0 = inlined_call_operand.vmem [shape: s32[8,1], index: 0, kind: input, shape index: {}]   ;;  %s261_s1 = inlined_call_operand.hbm [shape: f32[32,128], index: 1, kind: input, shape index: {}]   ;;  %s262_s2 = inlined_call_operand.hbm [shape: f32[8,128], index: 2, kind: output, shape index: {}]  }
   0x1   :  { %8 = vsyncpa [#allocation4], 0  ;;  %s210_s9 = smov [#allocation2]   ;;  %s162_s13 = scalar_lea.hbm %s261_s1, 512 }
   0x2   :  { %s16_s10 = sshll.u32 %s210_s9, 4  ;;  %p163_p0 = scmp.ne.s32.totalorder %s261_s1, %s162_s13  ;;  %s17_s10 = int_to_ptr.vmem [resolvable:$true] %s16_s10 }
   0x3   :  { %p166_p1 = scmp.lt.u32.totalorder %s162_s13, %s261_s1 }
   0x5   :  { %p168_p2 = pnand %p166_p1, %p163_p0 }
   0x7   :  { %171 = shalt.err (!%p168_p2)
}
   0x8   :  { %s172_s18 = scalar_lea.vmem %s17_s10, 512  ;;  %p177_p4 = scmp.lt.s32.totalorder %s17_s10, %s17_s10 }
   0x9   :  { %p173_p3 = scmp.ne.s32.totalorder %s17_s10, %s172_s18  ;;  %p178_p5 = scmp.lt.s32.totalorder %s172_s18, %s172_s18 }
   0xb   :  { %p179_p6 = por %p178_p5, %p177_p4 }
   0xd   :  { %p180_p7 = pnand %p179_p6, %p173_p3 }
   0xf   :  { %183 = shalt.err (!%p180_p7)
}
  0x10   :  { %s211_s19 = smov 128   ;;  %s212_s20 = smov 8  }
  0x11   :  { %22 = dma.hbm_to_vmem [thread:$0]  %s261_s1, 512, %s17_s10, [#allocation3], %s211_s19, %s211_s19, %s212_s20  }
  0x12   :  { %206 = dma.done.wait [#allocation3], 512  }
  0x13   :  { %207 = vsyncadd [#allocation3], 4294966784  ;;  %v213_v0 = vmov 0   ;;  %v214_v1 = vmov 0.0|0.0   ;;  %v26_v2 = vld [vmem:[%s260_s0] sm:$0xff]  ;;  %v36_v4 = vld [vmem:[#allocation2 + $0x8] sm:$0xff]  ;;  %v27_v10 = vlaneseq }
  0x14   :  { %161 = vset.pattern.permute.xlu0 %v213_v0  ;;  %147 = vmatprep.subr.bf16.mxu0 %v214_v1  ;;  %v35_v3 = vld [vmem:[#allocation2] sm:$0xff]  ;;  %v37_v6 = vld [vmem:[#allocation2 + $0x10] sm:$0xff]  ;;  %v38_v7 = vld [vmem:[#allocation2 + $0x18] sm:$0xff]  ;;  %vm215_vm0 = vmmov 0   ;;  %v216_v8 = vmov 0.0   ;;  %vm39_vm1 = vcmask 261120  }
  0x15   :  { %30 = vperm.xlu0 %161, %v26_v2   ;;  %v148_v5 = vpack.c.bf16 %v36_v4, %v35_v3  ;;  %144 = vmatprep.mubr.msk.f32.mxu0 %vm215_vm0, %v216_v8  ;;  %v151_v9 = vpack.c.bf16 %v38_v7, %v37_v6  ;;  %v28_v11 = vand.u32 127, %v27_v10  ;;  %s217_s0 = smov [#allocation5]  }
  0x16   :  { %s120_s1 = sshll.u32 %s217_s0, 4  ;;  %s121_s1 = int_to_ptr.vmem [resolvable:$true] %s120_s1 }
  0x17   :  { %149 = vmatpush3.bf16.msra.mxu0 %v148_v5  ;;  %s184_s25 = scalar_lea.vmem %s121_s1, 128  ;;  %p189_p9 = scmp.lt.s32.totalorder %s121_s1, %s121_s1 }
  0x18   :  { %150 = vmatprep.subr.bf16.mxu0 %v214_v1  ;;  %p185_p8 = scmp.ne.s32.totalorder %s121_s1, %s184_s25  ;;  %p190_p10 = scmp.lt.s32.totalorder %s184_s25, %s184_s25 }
  0x1a   :  { %p191_p11 = por %p190_p10, %p189_p9 }
  0x1b   :  { %152 = vmatpush3.bf16.msra.mxu0 %v151_v9 }
  0x1c   :  { %p192_p12 = pnand %p191_p11, %p185_p8 }
  0x94   :  { %v31_v12 = vpop.permute.xlu0 %30 }
  0x95   :  { %vm32_vm2 = vcmp.eq.s32.totalorder %v28_v11, %v31_v12 }
  0x96   :  { %v129_v13 = vsel %vm32_vm2, 1.0, %v216_v8 }
  0x97   :  { %145 = vmatmul.mubr.msk.f32.vlgmr.msra.gmra.mrb[0].mxu0 %vm39_vm1, %v129_v13 }
 0x16a   :  { %v109_v14 = vpop.f32.mrb[0].mxu0 }
 0x16b   :  { %113 = vst [vmem:[#allocation5] sm:$0xff] %v109_v14  ;;  %v146_v15 = vpop.f32.mrb[1].mxu0 }
 0x16c   :  { %195 = shalt.err (!%p192_p12)
}
 0x16d   :  { %s196_s28 = scalar_lea.hbm %s262_s2, 128 }
 0x16e   :  { %p197_p13 = scmp.ne.s32.totalorder %s262_s2, %s196_s28  ;;  %p200_p0 = scmp.lt.u32.totalorder %s196_s28, %s262_s2 }
 0x170   :  { %p202_p1 = pnand %p200_p0, %p197_p13 }
 0x172   :  { %205 = shalt.err (!%p202_p1)
}
 0x173   :  { %123 = dma.vmem_to_hbm [thread:$0]  %s121_s1, 128, %s262_s2, [#allocation4]  }
 0x174   :  { %208 = dma.done.wait [#allocation4], 128  }
 0x175   :  { %209 = vsyncadd [#allocation4], 4294967168 }
 0x176   :  { %127 = vsyncpa [#allocation3], 1 }
 0x177   :  { %128 = vsyncpa [#allocation4], 1 }

</bundles_post_ra>
